<compile_context>
chip_gen: v7x
topology: tpu7x:2x2x1
jax: 0.10.0
libtpu: 0.0.40
codegen_flags: <defaults>
</compile_context>

<pallas_src>
import functools

import jax
import jax.numpy as jnp
from jax import lax
from jax.experimental import pallas as pl
from jax.experimental.pallas import tpu as pltpu

LANE = 128
_FUSED_SLAB_BYTES = 4 * 1024 * 1024    # per-batch (C, HW) slab for the fused path
_STREAM_SLAB_BYTES = 6 * 1024 * 1024   # per-tile (C, hw_tile) slab, streaming path
_VMEM_LIMIT_BYTES = 40 * 1024 * 1024   # safe on v5e/v6e (128 MiB) and v7x (64 MiB)


def _round_up(x, m):
    return (x + m - 1) // m * m


def _fc_gate(pooled_col, w1_ref, b1_ref, w2_ref, b2_ref):
    """pooled_col: (C, 1) f32 -> sigmoid(W2 @ relu(W1 @ p + b1) + b2), (C, 1) f32."""
    h = jnp.dot(w1_ref[...], pooled_col,
                preferred_element_type=jnp.float32) + b1_ref[...]
    h = jnp.maximum(h, 0.0)
    s = jnp.dot(w2_ref[...], h,
                preferred_element_type=jnp.float32) + b2_ref[...]
    return jax.nn.sigmoid(s)


# ---------------------------------------------------------------------------
# Fused single-pass kernel (per-batch slab fits VMEM).
# ---------------------------------------------------------------------------
def _fused_kernel(x_ref, w1_ref, b1_ref, w2_ref, b2_ref, o_ref):
    # x_ref/o_ref: (1, C, HW) native dtype; weights/biases f32.
    x = x_ref[...]
    c = x.shape[1]
    pooled = jnp.mean(x.astype(jnp.float32), axis=-1, keepdims=True)  # (1, C, 1)
    gate = _fc_gate(pooled.reshape(c, 1), w1_ref, b1_ref, w2_ref, b2_ref)
    o_ref[...] = x * gate.reshape(1, c, 1).astype(x.dtype)


# ---------------------------------------------------------------------------
# Streaming pass 1: global average pool (f32 accumulation) + fused FC/sigmoid
# in the finalize step.  Ragged spatial tail masked in-kernel (no jnp.pad).
# ---------------------------------------------------------------------------
def _make_pool_fc_kernel(hw, hw_tile):
    ragged = (hw % hw_tile) != 0
    inv_hw = 1.0 / float(hw)

    def kernel(x_ref, w1_ref, b1_ref, w2_ref, b2_ref, g_ref):
        h = pl.program_id(1)

        @pl.when(h == 0)
        def _init():
            g_ref[...] = jnp.zeros_like(g_ref)

        x = x_ref[...].astype(jnp.float32)                 # (1, C, hw_tile)
        if ragged:
            # Zero lanes past the true HW extent (garbage in the partial block).
            col = h * hw_tile + lax.broadcasted_iota(jnp.int32, x.shape, 2)
            x = jnp.where(col < hw, x, 0.0)
        g_ref[...] += jnp.sum(x, axis=-1, keepdims=True)

        @pl.when(h == pl.num_programs(1) - 1)
        def _finalize():
            c = g_ref.shape[1]
            pooled = g_ref[...].reshape(c, 1) * inv_hw     # divide by TRUE HW
            gate = _fc_gate(pooled, w1_ref, b1_ref, w2_ref, b2_ref)
            g_ref[...] = gate.reshape(1, c, 1)

    return kernel


# ---------------------------------------------------------------------------
# Streaming pass 2: out = gate * x (gate pre-cast to x.dtype in the wrapper).
# Out-of-range columns of the partial last block are dropped by the store.
# ---------------------------------------------------------------------------
def _scale_kernel(g_ref, x_ref, o_ref):
    # g_ref: (1, C, 1); x_ref/o_ref: (1, C, hw_tile), all in the input dtype.
    o_ref[...] = x_ref[...] * g_ref[...]


# ---------------------------------------------------------------------------
# Wrapper
# ---------------------------------------------------------------------------
def se_weight_module(x_nchw, w1, b1, w2, b2, *,
                     fused_slab_bytes=_FUSED_SLAB_BYTES,
                     stream_slab_bytes=_STREAM_SLAB_BYTES):
    """x_nchw: (B, C, H, W). w1: (mid, C), b1: (mid,), w2: (C, mid), b2: (C,)."""
    B, C, H, W = x_nchw.shape
    HW = H * W
    mid = w1.shape[0]
    itemsize = x_nchw.dtype.itemsize

    x_flat = x_nchw.reshape(B, C, HW)
    w1f = w1.astype(jnp.float32)                    # (mid, C)
    w2f = w2.astype(jnp.float32)                    # (C, mid)
    b1c = b1.astype(jnp.float32).reshape(mid, 1)    # column biases (C on sublanes)
    b2c = b2.astype(jnp.float32).reshape(C, 1)

    cparams = functools.partial(pltpu.CompilerParams,
                                vmem_limit_bytes=_VMEM_LIMIT_BYTES)

    # ---- fused fast path -----------------------------------------------------
    if C * HW * itemsize <= fused_slab_bytes:
        out_flat = pl.pallas_call(
            _fused_kernel,
            out_shape=jax.ShapeDtypeStruct((B, C, HW), x_nchw.dtype),
            grid_spec=pltpu.PrefetchScalarGridSpec(
                num_scalar_prefetch=0,
                grid=(B,),
                in_specs=[
                    pl.BlockSpec((1, C, HW), lambda b: (b, 0, 0)),
                    pl.BlockSpec((mid, C), lambda b: (0, 0)),
                    pl.BlockSpec((mid, 1), lambda b: (0, 0)),
                    pl.BlockSpec((C, mid), lambda b: (0, 0)),
                    pl.BlockSpec((C, 1), lambda b: (0, 0)),
                ],
                out_specs=pl.BlockSpec((1, C, HW), lambda b: (b, 0, 0)),
            ),
            compiler_params=cparams(dimension_semantics=("parallel",)),
            cost_estimate=pl.CostEstimate(
                flops=2 * B * C * HW + 4 * B * C * mid,
                transcendentals=B * C,
                bytes_accessed=2 * B * C * HW * itemsize + 2 * C * mid * 4),
        )(x_flat, w1f, b1c, w2f, b2c)
        return out_flat.reshape(B, C, H, W)

    # ---- streaming path: lane-dense spatial tiles, no host-side pad/slice ----
    max_tile = max(LANE, (stream_slab_bytes // max(1, C * itemsize)) // LANE * LANE)
    hw_tile = min(_round_up(HW, LANE), max_tile)
    n_hw = pl.cdiv(HW, hw_tile)

    # Pass 1: pooled mean + FC + sigmoid -> gates (B, C, 1) f32.
    gates = pl.pallas_call(
        _make_pool_fc_kernel(HW, hw_tile),
        out_shape=jax.ShapeDtypeStruct((B, C, 1), jnp.float32),
        grid_spec=pltpu.PrefetchScalarGridSpec(
            num_scalar_prefetch=0,
            grid=(B, n_hw),                      # HW reduction axis last
            in_specs=[
                pl.BlockSpec((1, C, hw_tile), lambda b, h: (b, 0, h)),
                pl.BlockSpec((mid, C), lambda b, h: (0, 0)),
                pl.BlockSpec((mid, 1), lambda b, h: (0, 0)),
                pl.BlockSpec((C, mid), lambda b, h: (0, 0)),
                pl.BlockSpec((C, 1), lambda b, h: (0, 0)),
            ],
            out_specs=pl.BlockSpec((1, C, 1), lambda b, h: (b, 0, 0)),
        ),
        compiler_params=cparams(dimension_semantics=("parallel", "arbitrary")),
        cost_estimate=pl.CostEstimate(
            flops=B * C * HW + 4 * B * C * mid,
            transcendentals=B * C,
            bytes_accessed=B * C * HW * itemsize + B * C * 4 + 2 * C * mid * 4),
    )(x_flat, w1f, b1c, w2f, b2c)

    # Hoist the gate cast out of the bandwidth-critical pass (tiny XLA convert).
    gates = gates.astype(x_nchw.dtype)

    # Pass 2: out = gate * x.
    out_flat = pl.pallas_call(
        _scale_kernel,
        out_shape=jax.ShapeDtypeStruct((B, C, HW), x_nchw.dtype),
        grid_spec=pltpu.PrefetchScalarGridSpec(
            num_scalar_prefetch=0,
            grid=(B, n_hw),
            in_specs=[
                pl.BlockSpec((1, C, 1), lambda b, h: (b, 0, 0)),        # gate
                pl.BlockSpec((1, C, hw_tile), lambda b, h: (b, 0, h)),  # x
            ],
            out_specs=pl.BlockSpec((1, C, hw_tile), lambda b, h: (b, 0, h)),
        ),
        compiler_params=cparams(dimension_semantics=("parallel", "parallel")),
        cost_estimate=pl.CostEstimate(
            flops=B * C * HW,
            transcendentals=0,
            bytes_accessed=2 * B * C * HW * itemsize + B * C * itemsize),
    )(gates, x_flat)

    return out_flat.reshape(B, C, H, W)


# ---------------------------------------------------------------------------
# Reference, params, test
# ---------------------------------------------------------------------------
def init_params(key, channels, reduction):
    mid = channels // reduction
    k1, k2, k3, k4 = jax.random.split(key, 4)
    w1 = jax.random.normal(k1, (mid, channels), jnp.float32) * 0.1
    b1 = jax.random.normal(k2, (mid,), jnp.float32) * 0.1
    w2 = jax.random.normal(k3, (channels, mid), jnp.float32) * 0.1
    b2 = jax.random.normal(k4, (channels,), jnp.float32) * 0.1
    return w1, b1, w2, b2


def se_weight_reference(x, w1, b1, w2, b2):
    pooled = jnp.mean(x, axis=(2, 3))                       # (B, C)
    h = jnp.maximum(pooled @ w1.T + b1, 0.0)                # (B, mid)
    s = jax.nn.sigmoid(h @ w2.T + b2)                       # (B, C)
    return s[:, :, None, None] * x


if __name__ == "__main__":
    key = jax.random.PRNGKey(0)
    kx1, kx2, kp = jax.random.split(key, 3)

    # --- test 1: fused fast path (small feature map) -------------------------
    B, C, H, W = 2, 32, 16, 16
    reduction = 4  # mid = 8
    x = jax.random.normal(kx1, (B, C, H, W), jnp.float32)
    w1, b1, w2, b2 = init_params(kp, C, reduction)

    se_fused = jax.jit(se_weight_module)
    out = jax.block_until_ready(se_fused(x, w1, b1, w2, b2))
    ref = se_weight_reference(x, w1, b1, w2, b2)
    assert out.shape == (B, C, H, W)
    assert jnp.allclose(out, ref, atol=1e-5, rtol=1e-5)

    # --- test 2: streaming path with a ragged spatial tail (forced) ----------
    H2, W2 = 23, 23  # HW = 529: not a multiple of 128, >1 tile when forced small
    x2 = jax.random.normal(kx2, (B, C, H2, W2), jnp.float32)
    se_stream = jax.jit(functools.partial(
        se_weight_module, fused_slab_bytes=0, stream_slab_bytes=1 << 15))
    out2 = jax.block_until_ready(se_stream(x2, w1, b1, w2, b2))
    ref2 = se_weight_reference(x2, w1, b1, w2, b2)
    assert out2.shape == (B, C, H2, W2)
    assert jnp.allclose(out2, ref2, atol=1e-5, rtol=1e-5)

    print("KERNEL_OK")
</pallas_src>

<mosaic_0001>
module attributes {stable_mosaic.version = 11 : i64} {
  func.func @_fused_kernel(%arg0: i32, %arg1: memref<1x32x256xf32, #tpu.memory_space<vmem>>, %arg2: memref<8x32xf32, #tpu.memory_space<vmem>>, %arg3: memref<8x1xf32, #tpu.memory_space<vmem>>, %arg4: memref<32x8xf32, #tpu.memory_space<vmem>>, %arg5: memref<32x1xf32, #tpu.memory_space<vmem>>, %arg6: memref<1x32x256xf32, #tpu.memory_space<vmem>>) attributes {dimension_semantics = [#tpu.dimension_semantics<parallel>], iteration_bounds = array<i64: 2>, scalar_prefetch = 0 : i64, scratch_operands = 0 : i64, tpu.core_type = #tpu.core_type<tc>, window_params = [{transform_indices = @transform_0, window_bounds = array<i64: 1, 32, 256>}, {pipeline_mode = #tpu.pipeline_mode<synchronous>, transform_indices = @transform_1, window_bounds = array<i64: 8, 32>}, {pipeline_mode = #tpu.pipeline_mode<synchronous>, transform_indices = @transform_2, window_bounds = array<i64: 8, 1>}, {pipeline_mode = #tpu.pipeline_mode<synchronous>, transform_indices = @transform_3, window_bounds = array<i64: 32, 8>}, {pipeline_mode = #tpu.pipeline_mode<synchronous>, transform_indices = @transform_4, window_bounds = array<i64: 32, 1>}, {transform_indices = @transform_5, window_bounds = array<i64: 1, 32, 256>}]} {
    %c0 = arith.constant 0 : index
    %c0_0 = arith.constant 0 : index
    %c0_1 = arith.constant 0 : index
    %0 = vector.load %arg1[%c0, %c0_0, %c0_1] : memref<1x32x256xf32, #tpu.memory_space<vmem>>, vector<1x32x256xf32>
    %cst = arith.constant dense<0.000000e+00> : vector<1x32xf32>
    %1 = vector.multi_reduction <add>, %0, %cst [2] : vector<1x32x256xf32> to vector<1x32xf32>
    %2 = vector.shape_cast %1 : vector<1x32xf32> to vector<1x32x1xf32>
    %cst_2 = arith.constant 2.560000e+02 : f32
    %3 = vector.broadcast %cst_2 : f32 to vector<1x32x1xf32>
    %4 = arith.divf %2, %3 : vector<1x32x1xf32>
    %5 = vector.shape_cast %4 : vector<1x32x1xf32> to vector<32x1xf32>
    %c0_3 = arith.constant 0 : index
    %c0_4 = arith.constant 0 : index
    %6 = vector.load %arg2[%c0_3, %c0_4] : memref<8x32xf32, #tpu.memory_space<vmem>>, vector<8x32xf32>
    %cst_5 = arith.constant dense<0.000000e+00> : vector<8x1xf32>
    %7 = tpu.matmul %6, %5, %cst_5 {dimension_numbers = #tpu.dot_dimension_numbers<[1], [0], [0], [1], [0, 0, 1, 1], [], []>} : vector<8x32xf32>, vector<32x1xf32>, vector<8x1xf32> -> vector<8x1xf32>
    %c0_6 = arith.constant 0 : index
    %c0_7 = arith.constant 0 : index
    %8 = vector.load %arg3[%c0_6, %c0_7] : memref<8x1xf32, #tpu.memory_space<vmem>>, vector<8x1xf32>
    %9 = arith.addf %7, %8 : vector<8x1xf32>
    %cst_8 = arith.constant 0.000000e+00 : f32
    %10 = vector.broadcast %cst_8 : f32 to vector<8x1xf32>
    %11 = arith.maximumf %9, %10 : vector<8x1xf32>
    %c0_9 = arith.constant 0 : index
    %c0_10 = arith.constant 0 : index
    %12 = vector.load %arg4[%c0_9, %c0_10] : memref<32x8xf32, #tpu.memory_space<vmem>>, vector<32x8xf32>
    %cst_11 = arith.constant dense<0.000000e+00> : vector<32x1xf32>
    %13 = tpu.matmul %12, %11, %cst_11 {dimension_numbers = #tpu.dot_dimension_numbers<[1], [0], [0], [1], [0, 0, 1, 1], [], []>} : vector<32x8xf32>, vector<8x1xf32>, vector<32x1xf32> -> vector<32x1xf32>
    %c0_12 = arith.constant 0 : index
    %c0_13 = arith.constant 0 : index
    %14 = vector.load %arg5[%c0_12, %c0_13] : memref<32x1xf32, #tpu.memory_space<vmem>>, vector<32x1xf32>
    %15 = arith.addf %13, %14 : vector<32x1xf32>
    %16 = arith.negf %15 : vector<32x1xf32>
    %17 = math.exp %16 : vector<32x1xf32>
    %cst_14 = arith.constant 1.000000e+00 : f32
    %18 = vector.broadcast %cst_14 : f32 to vector<32x1xf32>
    %19 = arith.addf %18, %17 : vector<32x1xf32>
    %20 = arith.divf %18, %19 : vector<32x1xf32>
    %21 = vector.shape_cast %20 : vector<32x1xf32> to vector<1x32x1xf32>
    %22 = vector.broadcast %21 : vector<1x32x1xf32> to vector<1x32x256xf32>
    %23 = arith.mulf %0, %22 : vector<1x32x256xf32>
    %c0_15 = arith.constant 0 : index
    %c0_16 = arith.constant 0 : index
    %c0_17 = arith.constant 0 : index
    %24 = vector.load %arg6[%c0_15, %c0_16, %c0_17] : memref<1x32x256xf32, #tpu.memory_space<vmem>>, vector<1x32x256xf32>
    tpu.vector_store %arg6[%c0_15, %c0_16, %c0_17], %23 {strides = array<i32>} : memref<1x32x256xf32, #tpu.memory_space<vmem>>, vector<1x32x256xf32>,
    return
  }
  func.func @transform_0(%arg0: i32) -> (i32, i32, i32) {
    %c0_i32 = arith.constant 0 : i32
    %c0_i32_0 = arith.constant 0 : i32
    %c0_i32_1 = arith.constant 0 : i32
    return %arg0, %c0_i32, %c0_i32_0 : i32, i32, i32
  }
  func.func @transform_1(%arg0: i32) -> (i32, i32) {
    %c0_i32 = arith.constant 0 : i32
    %c0_i32_0 = arith.constant 0 : i32
    %c0_i32_1 = arith.constant 0 : i32
    return %c0_i32, %c0_i32_0 : i32, i32
  }
  func.func @transform_2(%arg0: i32) -> (i32, i32) {
    %c0_i32 = arith.constant 0 : i32
    %c0_i32_0 = arith.constant 0 : i32
    %c0_i32_1 = arith.constant 0 : i32
    return %c0_i32, %c0_i32_0 : i32, i32
  }
  func.func @transform_3(%arg0: i32) -> (i32, i32) {
    %c0_i32 = arith.constant 0 : i32
    %c0_i32_0 = arith.constant 0 : i32
    %c0_i32_1 = arith.constant 0 : i32
    return %c0_i32, %c0_i32_0 : i32, i32
  }
  func.func @transform_4(%arg0: i32) -> (i32, i32) {
    %c0_i32 = arith.constant 0 : i32
    %c0_i32_0 = arith.constant 0 : i32
    %c0_i32_1 = arith.constant 0 : i32
    return %c0_i32, %c0_i32_0 : i32, i32
  }
  func.func @transform_5(%arg0: i32) -> (i32, i32, i32) {
    %c0_i32 = arith.constant 0 : i32
    %c0_i32_0 = arith.constant 0 : i32
    %c0_i32_1 = arith.constant 0 : i32
    return %arg0, %c0_i32, %c0_i32_0 : i32, i32, i32
  }
}

</mosaic_0001>

<bundles_post_ra>
// kernel: se_weight_module.1
= control target key start
LH: loop header
LB: loop body
LE: loop exit
PB: predicated region body
PF: predicated region fallthrough
CT: control target
= control target key end

     0   :  { %s677_s18 = smov 0   ;;  %s763_s0 = inlined_call_operand.vmem [shape: f32[2,32,256], index: 0, kind: input, shape index: {}]   ;;  %s764_s1 = inlined_call_operand.vmem [shape: f32[8,32], index: 1, kind: input, shape index: {}]   ;;  %s765_s2 = inlined_call_operand.vmem [shape: f32[8,1], index: 2, kind: input, shape index: {}]   ;;  %s766_s3 = inlined_call_operand.vmem [shape: f32[32,8], index: 3, kind: input, shape index: {}]   ;;  %s767_s4 = inlined_call_operand.vmem [shape: f32[32,1], index: 4, kind: input, shape index: {}]   ;;  %s768_s5 = inlined_call_operand.vmem [shape: f32[2,32,256], index: 5, kind: output, shape index: {}]  }
   0x1 LB: > { %s548_s19 = sadd.s32 4294967295, %s641_s18   ;;  %p552_p0 = scmp.ge.s32.totalorder %s641_s18, 1  ;;  %s641_s18 = sphi %s677_s18, %s15_s18  }
   0x2   : > { %p187_p1 = scmp.lt.s32.totalorder %s641_s18, 3 }
   0x4   : > { %p188_p2 = pnand %p552_p0, %p187_p1 }
   0x5   : > { %p215_p3 = scmp.lt.s32.totalorder (!%p188_p2), %s548_s19, 1  ;;  %v643_v12 = vmov (!%p188_p2), 0.0|0.0   ;;  %vm644_vm0 = vmmov (!%p188_p2), 0   ;;  %v645_v13 = vmov (!%p188_p2), 0.0   ;;  %v250_v24 = vld [vmem:[%s764_s1] sm:$0xff] (!%p188_p2)  ;;  %vm252_vm1 = vcmask (!%p188_p2), 261120  }
   0x6   : > { %191 = sbr.rel (%p188_p2) target bundleno = 775 (0x307), region = 40  ;;  %599 = vmatprep.subr.bf16.mxu0 (!%p188_p2), %v643_v12  ;;  %588 = vmatprep.mubr.msk.f32.mxu0 (!%p188_p2), %vm644_vm0, %v645_v13  ;;  %v327_v25 = vld [vmem:[%s766_s3] sm:$0xff] (!%p188_p2)  ;;  %vm335_vm2 = vcmask (!%p188_p2), 64512   ;;  %v328_v31 = vld [vmem:[%s766_s3 + $0x8] sm:$0xff] (!%p188_p2)  ;;  %v329_v32 = vld [vmem:[%s766_s3 + $0x10] sm:$0xff] (!%p188_p2)  ;;  %v646_v34 = vmov (!%p188_p2), 0  }
   0x7   : > { %593 = vmatprep.mubr.msk.f32.mxu1 (!%p188_p2), %vm335_vm2, %v327_v25  ;;  %v251_v26 = vld [vmem:[%s765_s2] sm:$0xff] (!%p188_p2)  ;;  %v330_v33 = vld [vmem:[%s766_s3 + $0x18] sm:$0xff] (!%p188_p2)  ;;  %618 = vset.pattern.permute.xlu1 (!%p188_p2), %v646_v34  ;;  %v332_v35 = vld [vmem:[%s767_s4 + $0x8] sm:$0xff] (!%p188_p2) }
   0x8   : > { %617 = vset.pattern.permute.xlu0 (!%p188_p2), %v646_v34  ;;  %v331_v36 = vld [vmem:[%s767_s4] sm:$0xff] (!%p188_p2)  ;;  %v334_v41 = vld [vmem:[%s767_s4 + $0x18] sm:$0xff] (!%p188_p2)  ;;  %v333_v43 = vld [vmem:[%s767_s4 + $0x10] sm:$0xff] (!%p188_p2) }
   0xd   : > { %s770_s19 = smov (!%p215_p3, %s548_s19), 1 }
   0xe   : > { %s568_s20 = sshll.u32 %s770_s19, 6 }
   0xf   : > { %s219_s23 = scalar_lea.vmem %s763_s0, %s568_s20  ;;  %s224_s24 = scalar_lea.vmem %s768_s5, %s568_s20 }
  0x10   : > { %v693_v0 = vld [vmem:[%s219_s23 + $0x20] sm:$0xff]  ;;  %v695_v1 = vld [vmem:[%s219_s23 + $0x28] sm:$0xff]  ;;  %v703_v5 = vld [vmem:[%s219_s23 + $0x30] sm:$0xff] }
  0x11   : > { %v697_v2 = vld [vmem:[%s219_s23] sm:$0xff]  ;;  %v239_v3 = vadd.f32 %v695_v1, %v693_v0  ;;  %v701_v4 = vld [vmem:[%s219_s23 + $0x8] sm:$0xff]  ;;  %v705_v6 = vld [vmem:[%s219_s23 + $0x38] sm:$0xff] }
  0x12   : > { %v233_v7 = vadd.f32 %v701_v4, %v697_v2  ;;  %v709_v8 = vld [vmem:[%s219_s23 + $0x10] sm:$0xff]  ;;  %v711_v9 = vld [vmem:[%s219_s23 + $0x18] sm:$0xff]  ;;  %v242_v10 = vadd.f32 %v705_v6, %v703_v5 }
  0x13   : > { %240 = vadd.xlane.f32.xlu1 %v239_v3  ;;  %v236_v11 = vadd.f32 %v711_v9, %v709_v8 }
  0x14   : > { %234 = vadd.xlane.f32.xlu0 %v233_v7 }
  0x17   : > { %243 = vadd.xlane.f32.xlu1 %v242_v10 }
  0x18   : > { %237 = vadd.xlane.f32.xlu0 %v236_v11 }
  0xa0   : > { %v241_v14 = vpop.xlane.xlu1 %240 }
  0xa1   : > { %v235_v15 = vpop.xlane.xlu0 %234  ;;  %v248_v20 = vmul.f32 0.00390625, %v241_v14 }
  0xa2   : > { %v246_v18 = vmul.f32 0.00390625, %v235_v15 }
  0xa4   : > { %v244_v16 = vpop.xlane.xlu1 %243 }
  0xa5   : > { %v238_v17 = vpop.xlane.xlu0 %237  ;;  %v249_v21 = vmul.f32 0.00390625, %v244_v16 }
  0xa6   : > { %v247_v19 = vmul.f32 0.00390625, %v238_v17 }
  0xa7   : > { %v603_v23 = vpack.c.bf16 %v249_v21, %v248_v20 }
  0xa8   : > { %v600_v22 = vpack.c.bf16 %v247_v19, %v246_v18 }
  0xaa   : > { %601 = vmatpush3.bf16.msra.mxu0 %v600_v22 }
  0xab   : > { %602 = vmatprep.subr.bf16.mxu0 %v643_v12 }
  0xae   : > { %604 = vmatpush3.bf16.msra.mxu0 %v603_v23 }
  0xb1   : > { %589 = vmatmul.mubr.msk.f32.vlgmr.msra.gmra.mrb[0].mxu0 %vm252_vm1, %v250_v24 }
 0x184   : > { %v322_v27 = vpop.f32.mrb[0].mxu0 }
 0x185   : > { %v323_v28 = vadd.f32 %v322_v27, %v251_v26  ;;  %v590_v29 = vpop.f32.mrb[1].mxu0 }
 0x187   : > { %v326_v30 = vmax.f32 %v323_v28, 0.0 }
 0x189   : > { %591 = vmatprep.subr.mxu1 %v326_v30 }
 0x18a   : > { %592 = vmatpush3.msra.mxu1 %v326_v30 }
 0x18b   : > { %594 = vmatmul.mubr.msk.f32.vlgmr.msra.gmra.mrb[0].mxu1 %vm335_vm2, %v328_v31 }
 0x18c   : > { %596 = vmatprep.mubr.msk.f32.mxu1 %vm335_vm2, %v329_v32 }
 0x18f   : > { %597 = vmatmul.mubr.msk.f32.gmra.mrb[2].mxu1 %vm335_vm2, %v330_v33 }
 0x25e   : > { %v595_v37 = vpop.f32.mrb[0].mxu1 }
 0x25f   : > { %v420_v38 = vadd.f32 %v595_v37, %v332_v35  ;;  %v414_v39 = vpop.f32.mrb[1].mxu1 }
 0x260   : > { %v415_v40 = vadd.f32 %v414_v39, %v331_v36 }
 0x261   : > { %v563_v42 = vmul.f32 -1.442695, %v420_v38 }
 0x262   : > { %v562_v44 = vmul.f32 -1.442695, %v415_v40  ;;  %v598_v45 = vpop.f32.mrb[2].mxu1 }
 0x263   : > { %619 = vpow2.f32 %v563_v42  ;;  %v430_v46 = vadd.f32 %v598_v45, %v334_v41  ;;  %v424_v47 = vpop.f32.mrb[3].mxu1 }
 0x264   : > { %621 = vpow2.f32 %v562_v44  ;;  %v425_v48 = vadd.f32 %v424_v47, %v333_v43 }
 0x265   : > { %v565_v49 = vmul.f32 -1.442695, %v430_v46 }
 0x266   : > { %v564_v50 = vmul.f32 -1.442695, %v425_v48 }
 0x267   : > { %623 = vpow2.f32 %v565_v49 }
 0x268   : > { %625 = vpow2.f32 %v564_v50 }
 0x26d   : > { %v620_v51 = vpop.eup %619 }
 0x26e   : > { %v622_v52 = vpop.eup %621  ;;  %v446_v53 = vadd.f32 1.0, %v620_v51 }
 0x26f   : > { %v445_v54 = vadd.f32 1.0, %v622_v52 }
 0x270   : > { %627 = vrcp.f32 %v446_v53 }
 0x271   : > { %v624_v55 = vpop.eup %623  ;;  %629 = vrcp.f32 %v445_v54 }
 0x272   : > { %v626_v56 = vpop.eup %625  ;;  %v448_v58 = vadd.f32 1.0, %v624_v55 }
 0x273   : > { %v447_v57 = vadd.f32 1.0, %v626_v56 }
 0x275   : > { %631 = vrcp.f32 %v447_v57 }
 0x276   : > { %633 = vrcp.f32 %v448_v58 }
 0x27a   : > { %v628_v59 = vpop.eup %627 }
 0x27b   : > { %v630_v60 = vpop.eup %629  ;;  %464 = vperm.xlu1 %618, %v628_v59  }
 0x27c   : > { %459 = vperm.xlu0 %617, %v630_v60  }
 0x27f   : > { %v632_v61 = vpop.eup %631 }
 0x280   : > { %469 = vperm.xlu1 %618, %v632_v61   ;;  %v634_v62 = vpop.eup %633 }
 0x284   : > { %474 = vperm.xlu1 %618, %v634_v62  }
 0x2fa   : > { %v465_v63 = vpop.permute.xlu1 %464 }
 0x2fb   : > { %v479_v3 = vmul.f32 %v465_v63, %v709_v8  ;;  %v480_v7 = vmul.f32 %v465_v63, %v711_v9  ;;  %v460_v10 = vpop.permute.xlu0 %459 }
 0x2fc   : > { %v477_v11 = vmul.f32 %v460_v10, %v697_v2  ;;  %v478_v12 = vmul.f32 %v460_v10, %v701_v4 }
 0x2fd   : > { %487 = vst [vmem:[%s224_s24 + $0x10] sm:$0xff] %v479_v3  ;;  %488 = vst [vmem:[%s224_s24 + $0x18] sm:$0xff] %v480_v7 }
 0x2fe   : > { %485 = vst [vmem:[%s224_s24] sm:$0xff] %v477_v11  ;;  %486 = vst [vmem:[%s224_s24 + $0x8] sm:$0xff] %v478_v12 }
 0x2ff   : > { %v470_v13 = vpop.permute.xlu1 %469 }
 0x300   : > { %v481_v14 = vmul.f32 %v470_v13, %v693_v0  ;;  %v482_v15 = vmul.f32 %v470_v13, %v695_v1 }
 0x302   : > { %489 = vst [vmem:[%s224_s24 + $0x20] sm:$0xff] %v481_v14  ;;  %490 = vst [vmem:[%s224_s24 + $0x28] sm:$0xff] %v482_v15 }
 0x303   : > { %v475_v16 = vpop.permute.xlu1 %474 }
 0x304   : > { %v483_v8 = vmul.f32 %v475_v16, %v703_v5  ;;  %v484_v9 = vmul.f32 %v475_v16, %v705_v6 }
 0x306   : > { %491 = vst [vmem:[%s224_s24 + $0x30] sm:$0xff] %v483_v8  ;;  %492 = vst [vmem:[%s224_s24 + $0x38] sm:$0xff] %v484_v9 }
 0x307 PF: > { %s15_s18 = sadd.s32 1, %s641_s18  }
 0x308   : > { %p12_p4 = scmp.ge.s32.totalorder %s15_s18, 4  }
 0x30a   :  { %14 = sbr.rel (!%p12_p4) target bundleno = 1 (0x1), region = 70 }

</bundles_post_ra>
